<compile_context>
chip_gen: v7x
topology: tpu7x:2x2x1
jax: 0.10.0
libtpu: 0.0.40
codegen_flags: <defaults>
</compile_context>

<pallas_src>
import functools

import numpy as np
import jax
import jax.numpy as jnp
from jax.experimental import pallas as pl
from jax.experimental.pallas import tpu as pltpu


# ----------------------------------------------------------------------------
# Host-side sinusoid table (identical to the PyTorch buffer).
# ----------------------------------------------------------------------------
def _get_sinusoid_encoding_table(max_len: int, d_hid: int) -> jnp.ndarray:
    pos = np.arange(max_len, dtype=np.float64)[:, None]              # (L, 1)
    hid = np.arange(d_hid, dtype=np.int64)[None, :]                  # (1, D)
    angle = pos / np.power(10000.0, 2.0 * (hid // 2) / float(d_hid))
    table = np.empty((max_len, d_hid), dtype=np.float64)
    table[:, 0::2] = np.sin(angle[:, 0::2])
    table[:, 1::2] = np.cos(angle[:, 1::2])
    return jnp.asarray(table, dtype=jnp.float32)


# ----------------------------------------------------------------------------
# Kernels
# ----------------------------------------------------------------------------
def _pos_enc_table_kernel(x_ref, pos_ref, o_ref):
    # x_ref: (TS, B, D); pos_ref: (TS, D) float32. Add in f32, cast to out dtype.
    x = x_ref[...].astype(jnp.float32)
    o_ref[...] = (x + pos_ref[...][:, None, :]).astype(o_ref.dtype)


def _pos_enc_onchip_kernel(x_ref, o_ref, *, d_hid: int, seq_tile: int):
    # Small-batch path: generate the sinusoid rows for this seq tile on-chip.
    # table[s, j] = sin/cos( s / 10000 ** (2*(j//2)/d_hid) ), even j -> sin.
    seq0 = pl.program_id(0) * seq_tile
    row = jax.lax.broadcasted_iota(jnp.int32, (seq_tile, d_hid), 0) + seq0
    lane = jax.lax.broadcasted_iota(jnp.int32, (seq_tile, d_hid), 1)
    parity = lane & 1                               # 0 for even lanes, 1 for odd
    pair = (lane - parity).astype(jnp.float32)      # 2 * (j // 2), no int division
    inv_denom = jnp.exp(pair * float(-np.log(10000.0) / d_hid))   # 10000**-(2(j//2)/D)
    angle = row.astype(jnp.float32) * inv_denom
    table = jnp.where(parity == 0, jnp.sin(angle), jnp.cos(angle))   # (TS, D) f32
    x = x_ref[...].astype(jnp.float32)              # (TS, B, D)
    o_ref[...] = (x + table[:, None, :]).astype(o_ref.dtype)


# ----------------------------------------------------------------------------
# Layout-aware tile sizing
# ----------------------------------------------------------------------------
_LANE = 128
_VMEM_BUDGET = 24 * 1024 * 1024    # double-buffered working-set target
_TARGET_TILE = 6 * 1024 * 1024     # per-tile padded x bytes near the HBM roofline plateau


def _round_up(x: int, m: int) -> int:
    return ((x + m - 1) // m) * m


def _sublane_pack(itemsize: int) -> int:
    # rows packed per sublane group: 8 f32, 16 bf16, 32 int8/fp8
    return max(8, 32 // max(itemsize, 1))


def _pick_seq_tile_onchip(seq_len, batch, d_hid, itemsize):
    pack = _sublane_pack(itemsize)
    pad_b = _round_up(batch, pack)
    pad_d = _round_up(d_hid, _LANE)
    io_row = 2 * pad_b * pad_d * itemsize          # padded x row + out row
    tbl_row = pad_d * 4                            # on-chip f32 table intermediate
    per_row = 2 * io_row + tbl_row                 # 2x = double-buffered in/out tiles
    ts_budget = max(1, _VMEM_BUDGET // per_row)
    ts_target = max(1, _TARGET_TILE // (pad_b * pad_d * itemsize))
    ts = min(ts_budget, ts_target, seq_len)
    # v7x: keep at least 2 (prefer 4) tiles so the parallel axis spans both TCs.
    if seq_len >= 4:
        want = 4 if seq_len >= 32 else 2
        ts = min(ts, pl.cdiv(seq_len, want))
    if ts < seq_len and ts >= 8:
        ts = (ts // 8) * 8                         # dense sublanes for the table intermediate
    ts = max(1, min(ts, seq_len))
    return ts, ts * per_row


def _pick_seq_tile_table(seq_len, batch, d_hid, itemsize):
    pack = _sublane_pack(itemsize)
    pad_b = _round_up(batch, pack)
    pad_d = _round_up(d_hid, _LANE)
    # double-buffered (x tile + out tile + f32 pos tile), padded layout
    per_row = 2 * (2 * pad_b * pad_d * itemsize + pad_d * 4)
    ts_budget = max(8, _VMEM_BUDGET // per_row)
    ts_target = max(8, _TARGET_TILE // (pad_b * pad_d * itemsize))
    ts = min(ts_budget, ts_target)
    # v7x: >= 2 tiles when the seq axis can be split on 8-row (pos sublane) boundaries.
    if seq_len >= 16:
        want = 4 if seq_len >= 32 else 2
        ts = min(ts, _round_up(pl.cdiv(seq_len, want), 8))
    if ts >= seq_len:
        return seq_len, seq_len * per_row          # single full-extent block (always legal)
    ts = max(8, (ts // 8) * 8)                     # pos block sublane alignment
    return ts, ts * per_row


def _vmem_limit(working_set_bytes: int) -> int:
    # 32 MiB default (raises v5e's 16 MiB scoped default); raise with headroom for
    # very large rows but stay under v7x's 64 MiB physical VMEM per TensorCore.
    return int(min(max(32 * 1024 * 1024, working_set_bytes * 5 // 4), 56 * 1024 * 1024))


# ----------------------------------------------------------------------------
# Forward
# ----------------------------------------------------------------------------
def positional_encoding_forward(x: jnp.ndarray, pos_table: jnp.ndarray,
                                *, donate_x: bool = False) -> jnp.ndarray:
    """x: (seq_len, batch, d_hid); pos_table: (max_len, d_hid) float32."""
    seq_len, batch, d_hid = x.shape
    max_len, table_d = pos_table.shape
    if table_d != d_hid:
        raise ValueError(f"d_hid mismatch: x has {d_hid}, pos_table has {table_d}")
    if seq_len > max_len:
        raise ValueError(f"seq_len={seq_len} exceeds max_len={max_len} of pos_table")

    itemsize = jnp.dtype(x.dtype).itemsize
    out_shape = jax.ShapeDtypeStruct((seq_len, batch, d_hid), x.dtype)
    aliases = {0: 0} if donate_x else {}
    pack = _sublane_pack(itemsize)

    if batch < pack:
        # Small batch: pos read would be a large fraction of HBM traffic (1/(2B+1));
        # generate the sinusoid rows on-chip instead (VPU/EUP are idle here).
        ts, ws = _pick_seq_tile_onchip(seq_len, batch, d_hid, itemsize)
        kernel = functools.partial(_pos_enc_onchip_kernel, d_hid=d_hid, seq_tile=ts)
        return pl.pallas_call(
            kernel,
            out_shape=out_shape,
            grid_spec=pltpu.PrefetchScalarGridSpec(
                num_scalar_prefetch=0,
                grid=(pl.cdiv(seq_len, ts),),
                in_specs=[pl.BlockSpec((ts, batch, d_hid), lambda i: (i, 0, 0))],
                out_specs=pl.BlockSpec((ts, batch, d_hid), lambda i: (i, 0, 0)),
            ),
            compiler_params=pltpu.CompilerParams(
                dimension_semantics=("parallel",),
                vmem_limit_bytes=_vmem_limit(ws),
            ),
            input_output_aliases=aliases,
        )(x)

    # Large batch: stream the precomputed table (kept in float32 -> f32 add matches
    # the PyTorch module's math; pos read is <= ~6% of traffic at batch >= 8).
    pos = pos_table[:seq_len, :].astype(jnp.float32)
    ts, ws = _pick_seq_tile_table(seq_len, batch, d_hid, itemsize)
    return pl.pallas_call(
        _pos_enc_table_kernel,
        out_shape=out_shape,
        grid_spec=pltpu.PrefetchScalarGridSpec(
            num_scalar_prefetch=0,
            grid=(pl.cdiv(seq_len, ts),),
            in_specs=[
                pl.BlockSpec((ts, batch, d_hid), lambda i: (i, 0, 0)),
                pl.BlockSpec((ts, d_hid), lambda i: (i, 0)),
            ],
            out_specs=pl.BlockSpec((ts, batch, d_hid), lambda i: (i, 0, 0)),
        ),
        compiler_params=pltpu.CompilerParams(
            dimension_semantics=("parallel",),
            vmem_limit_bytes=_vmem_limit(ws),
        ),
        input_output_aliases=aliases,
    )(x, pos)


if __name__ == "__main__":
    max_len, d_hid, seq_len = 16, 32, 8
    pos_table = _get_sinusoid_encoding_table(max_len, d_hid)
    ref_pos = pos_table[:seq_len, :][:, None, :]

    key = jax.random.PRNGKey(0)
    k1, k2 = jax.random.split(key)

    # Path 1: small batch -> on-chip sinusoid generation.
    x_small = jax.random.normal(k1, (seq_len, 2, d_hid), dtype=jnp.float32)
    out_small = jax.block_until_ready(positional_encoding_forward(x_small, pos_table))
    ref_small = x_small + ref_pos
    np.testing.assert_allclose(np.asarray(out_small), np.asarray(ref_small),
                               rtol=1e-5, atol=1e-5)

    # Path 2: batch >= sublane pack -> precomputed-table path (exact table values).
    x_big = jax.random.normal(k2, (seq_len, 16, d_hid), dtype=jnp.float32)
    out_big = jax.block_until_ready(positional_encoding_forward(x_big, pos_table))
    ref_big = x_big + ref_pos
    np.testing.assert_allclose(np.asarray(out_big), np.asarray(ref_big),
                               rtol=1e-6, atol=1e-6)

    print("KERNEL_OK")
</pallas_src>

<mosaic_0001>
module attributes {stable_mosaic.version = 11 : i64} {
  func.func @_pos_enc_onchip_kernel(%arg0: i32, %arg1: memref<4x2x32xf32, #tpu.memory_space<vmem>>, %arg2: memref<4x2x32xf32, #tpu.memory_space<vmem>>) attributes {dimension_semantics = [#tpu.dimension_semantics<parallel>], iteration_bounds = array<i64: 2>, scalar_prefetch = 0 : i64, scratch_operands = 0 : i64, tpu.core_type = #tpu.core_type<tc>, window_params = [{transform_indices = @transform_0, window_bounds = array<i64: 4, 2, 32>}, {transform_indices = @transform_1, window_bounds = array<i64: 4, 2, 32>}]} {
    %c4_i32 = arith.constant 4 : i32
    %0 = arith.muli %arg0, %c4_i32 : i32
    %1 = tpu.iota {dimensions = array<i32: 0>} : vector<4x32xi32>
    %2 = vector.broadcast %0 : i32 to vector<4x32xi32>
    %3 = arith.addi %1, %2 : vector<4x32xi32>
    %4 = tpu.iota {dimensions = array<i32: 1>} : vector<4x32xi32>
    %c1_i32 = arith.constant 1 : i32
    %5 = vector.broadcast %c1_i32 : i32 to vector<4x32xi32>
    %6 = arith.andi %4, %5 : vector<4x32xi32>
    %7 = arith.subi %4, %6 : vector<4x32xi32>
    %8 = arith.sitofp %7 : vector<4x32xi32> to vector<4x32xf32>
    %cst = arith.constant -0.287823141 : f32
    %9 = vector.broadcast %cst : f32 to vector<4x32xf32>
    %10 = arith.mulf %8, %9 : vector<4x32xf32>
    %11 = math.exp %10 : vector<4x32xf32>
    %12 = arith.sitofp %3 : vector<4x32xi32> to vector<4x32xf32>
    %13 = arith.mulf %12, %11 : vector<4x32xf32>
    %c0_i32 = arith.constant 0 : i32
    %14 = vector.broadcast %c0_i32 : i32 to vector<4x32xi32>
    %15 = arith.cmpi eq, %6, %14 : vector<4x32xi32>
    %16 = math.sin %13 : vector<4x32xf32>
    %17 = math.cos %13 : vector<4x32xf32>
    %18 = arith.select %15, %16, %17 : vector<4x32xi1>, vector<4x32xf32>
    %c0 = arith.constant 0 : index
    %c0_0 = arith.constant 0 : index
    %c0_1 = arith.constant 0 : index
    %19 = vector.load %arg1[%c0, %c0_0, %c0_1] : memref<4x2x32xf32, #tpu.memory_space<vmem>>, vector<4x2x32xf32>
    %20 = vector.shape_cast %18 : vector<4x32xf32> to vector<4x1x32xf32>
    %21 = vector.broadcast %20 : vector<4x1x32xf32> to vector<4x2x32xf32>
    %22 = arith.addf %19, %21 : vector<4x2x32xf32>
    %c0_2 = arith.constant 0 : index
    %c0_3 = arith.constant 0 : index
    %c0_4 = arith.constant 0 : index
    %23 = vector.load %arg2[%c0_2, %c0_3, %c0_4] : memref<4x2x32xf32, #tpu.memory_space<vmem>>, vector<4x2x32xf32>
    tpu.vector_store %arg2[%c0_2, %c0_3, %c0_4], %22 {strides = array<i32>} : memref<4x2x32xf32, #tpu.memory_space<vmem>>, vector<4x2x32xf32>,
    return
  }
  func.func @transform_0(%arg0: i32) -> (i32, i32, i32) {
    %c0_i32 = arith.constant 0 : i32
    %c0_i32_0 = arith.constant 0 : i32
    %c0_i32_1 = arith.constant 0 : i32
    return %arg0, %c0_i32, %c0_i32_0 : i32, i32, i32
  }
  func.func @transform_1(%arg0: i32) -> (i32, i32, i32) {
    %c0_i32 = arith.constant 0 : i32
    %c0_i32_0 = arith.constant 0 : i32
    %c0_i32_1 = arith.constant 0 : i32
    return %arg0, %c0_i32, %c0_i32_0 : i32, i32, i32
  }
}

</mosaic_0001>

<bundles_post_ra>
// kernel: tpu_custom_call.1
= control target key start
LH: loop header
LB: loop body
LE: loop exit
PB: predicated region body
PF: predicated region fallthrough
CT: control target
= control target key end

     0   :  { %6 = vsyncpa [#allocation3], 0  ;;  %s930_s0 = inlined_call_operand.hbm [shape: f32[8,2,32], index: 0, kind: input, shape index: {}]   ;;  %s931_s1 = inlined_call_operand.hbm [shape: f32[8,2,32], index: 1, kind: output, shape index: {}]  }
   0x1   :  { %8 = vsyncpa [#allocation3 + $0x1], 0 }
   0x2   :  { %9 = vsyncpa [#allocation4], 0 }
   0x3   :  { %11 = vsyncpa [#allocation4 + $0x1], 0  ;;  %s719_s6 = smov 0   ;;  %s721_s7 = smov 0  }
   0x4   :  { %s723_s8 = smov 0   ;;  %s725_s9 = smov 0  }
   0x5 LB: > { %s740_s10 = sadd.s32 4294967295, %s694_s9   ;;  %s506_s11 = sadd.s32 4294967294, %s694_s9   ;;  %s694_s9 = sphi %s725_s9, %s944_s9   ;;  %s690_s8 = sphi %s723_s8, %s943_s8   ;;  %s686_s7 = sphi %s721_s7, %s942_s7   ;;  %s682_s6 = sphi %s719_s6, %s941_s6  }
   0x6   : > { %s744_s12 = sadd.s32 1, %s694_s9   ;;  %s24_s13 = sadd.s32 1, %s690_s8 }
   0x7   : > { %s21_s14 = ssub.s32 %s694_s9, %s744_s12  ;;  %p31_p0 = scmp.ne.s32.totalorder %s690_s8, %s686_s7 }
   0x8   : > { %p22_p1 = scmp.eq.s32.totalorder %s21_s14, 0  ;;  %p32_p2 = scmp.eq.s32.totalorder %s694_s9, 0 }
   0x9   : > { %p37_p3 = scmp.ne.s32.totalorder %s686_s7, %s682_s6  ;;  %p38_p4 = scmp.eq.s32.totalorder %s740_s10, 0 }
   0xa   : > { %s756_s15 = scalar_select %p22_p1, %s690_s8, %s24_s13  }
   0xb   : > { %p758_p5 = por %p32_p2, %p31_p0  ;;  %p762_p6 = por %p38_p4, %p37_p3 }
   0xc   : > { %p61_p7 = scmp.eq.s32.totalorder %s740_s10, 1  ;;  %p67_p8 = scmp.eq.s32.totalorder %s506_s11, 1 }
   0xd   : > { %p547_p10 = scmp.lt.s32.totalorder %s694_s9, 2  ;;  %s87_s20 = sand.u32 1, %s690_s8  }
   0xe   : > { %p769_p11 = por %p61_p7, %p31_p0  ;;  %p773_p12 = por %p67_p8, %p37_p3 }
   0xf   : > { %s529_s21 = sshll.u32 %s694_s9, 7  ;;  %s509_s22 = sshll.u32 %s87_s20, 3 }
  0x10   : > { %s935_s18 = scalar_select %p769_p11, 1, 0 }
  0x11   : > { %s936_s19 = scalar_select %p773_p12, 1, 0 }
  0x12   : > { %s782_s25 = scalar_lea.hbm %s930_s0, %s529_s21  ;;  %s91_s26 = scalar_lea.vmem [#allocation2], %s509_s22 }
  0x13   : > { %s98_s27 = sshll.u32 %s91_s26, 4  ;;  %p786_p13 = pnand %p547_p10, %p758_p5  ;;  %s790_s27 = int_to_ptr.vmem [resolvable:$true] %s98_s27 }
  0x14   : > { %s792_s29 = scalar_lea.sflag [#allocation3], %s87_s20  ;;  %s598_s30 = scalar_lea.hbm %s782_s25, 128 }
  0x15   : > { %p599_p0 = scmp.ne.s32.totalorder %s782_s25, %s598_s30  ;;  %p600_p1 = pneg %p786_p13 }
  0x16   : > { %s603_s4 = scalar_lea.hbm %s930_s0, 256  ;;  %p604_p4 = scmp.lt.u32.totalorder %s782_s25, %s930_s0 }
  0x17   : > { %p601_p2 = pnand %p600_p1, %p599_p0  ;;  %p605_p5 = scmp.lt.u32.totalorder %s603_s4, %s598_s30 }
  0x18   : > { %p607_p8 = scmp.lt.u32.totalorder %s598_s30, %s782_s25 }
  0x19   : > { %p602_p3 = pneg %p601_p2  ;;  %p606_p7 = por %p605_p5, %p604_p4 }
  0x1b   : > { %p608_p10 = por %p607_p8, %p606_p7 }
  0x1d   : > { %p609_p9 = pnand %p608_p10, %p602_p3 }
  0x1f   : > { %612 = shalt.err (!%p609_p9)
}
  0x20   : > { %s613_s13 = scalar_lea.vmem %s790_s27, 128  ;;  %s696_s14 = smov [#allocation2]  }
  0x21   : > { %p614_p0 = scmp.ne.s32.totalorder %s790_s27, %s613_s13  ;;  %s618_s16 = sshll.u32 %s696_s14, 4  ;;  %s619_s16 = int_to_ptr.vmem [resolvable:$false] %s618_s16 }
  0x22   : > { %s620_s20 = scalar_lea.vmem %s619_s16, 256  ;;  %p621_p11 = scmp.lt.s32.totalorder %s790_s27, %s619_s16 }
  0x23   : > { %p616_p2 = pnand %p614_p0, %p600_p1  ;;  %p622_p4 = scmp.lt.s32.totalorder %s620_s20, %s613_s13 }
  0x25   : > { %p617_p12 = pneg %p616_p2  ;;  %p623_p5 = por %p622_p4, %p621_p11 }
  0x27   : > { %p624_p7 = pnand %p623_p5, %p617_p12 }
  0x29   : > { %627 = shalt.err (!%p624_p7)
}
  0x2a   : > { %s697_s21 = smov 32   ;;  %s698_s22 = smov 2  }
  0x2b   : > { %542 = dma.hbm_to_vmem [thread:$0]  (!%p786_p13), %s782_s25, 128, %s790_s27, %s792_s29, %s697_s21, %s697_s21, %s698_s22  }
  0x2c   : > { %p512_p9 = scmp.ge.s32.totalorder %s694_s9, 1  ;;  %p106_p1 = scmp.lt.s32.totalorder %s694_s9, 3 }
  0x2e   : > { %p107_p3 = pnand %p512_p9, %p106_p1 }
  0x2f   : > { %s823_s23 = sand.u32 (!%p107_p3), 1, %s686_s7  }
  0x30   : > { %110 = sbr.rel (%p107_p3) target bundleno = 191 (0xbf), region = 24  ;;  %s513_s24 = sshll.u32 (!%p107_p3), %s823_s23, 3 }
  0x31   : > { %s113_s26 = scalar_lea.sflag (!%p107_p3), [#allocation3], %s823_s23  ;;  %s829_s30 = scalar_lea.vmem (!%p107_p3), [#allocation2], %s513_s24 }
  0x37   : > { %673 = dma.done.wait (%p762_p6), %s113_s26, 128  }
  0x38   : > { %675 = vsyncadd (%p762_p6), %s113_s26, 4294967168  ;;  %v138_v0 = vlaneseq  ;;  %s515_s25 = sshll.u32 %s740_s10, 2  ;;  %v699_v24 = vmov 683565275   ;;  %v700_v26 = vmov 2475754826  }
  0x39   : > { %v140_v8 = vstv %s515_s25  ;;  %v701_v28 = vmov 2131351028   ;;  %v702_v30 = vmov 2102212464   ;;  %v703_v32 = vmov 920167782  }
  0x3a   : > { %v835_v1 = vand.u32 127, %v138_v0  ;;  %v842_v7 = vshrl.u32 %v138_v0, 7  ;;  %v704_v39 = vmov 1326507024   ;;  %s134_s17 = scalar_lea.vmem [#allocation5], %s513_s24  ;;  %s530_s28 = sshll.u32 %s740_s10, 7 }
  0x3b   : > { %s433_s27 = sshll.u32 %s134_s17, 4  ;;  %s883_s3 = scalar_lea.hbm %s931_s1, %s530_s28  ;;  %s878_s27 = int_to_ptr.vmem [resolvable:$true] %s433_s27 }
  0x3c   : > { %v144_v2 = vand.u32 1, %v835_v1  ;;  %v141_v9 = vadd.s32 %v140_v8, %v842_v7  ;;  %s420_s10 = scalar_lea.sflag [#allocation4], %s823_s23  ;;  %s628_s4 = scalar_lea.vmem %s878_s27, 128 }
  0x3d   : > { %p629_p6 = scmp.ne.s32.totalorder %s878_s27, %s628_s4  ;;  %p938_p11 = scmp.ne.s32.totalorder %s935_s18, 0 }
  0x3e   : > { %v145_v3 = vsub.s32 %v835_v1, %v144_v2  ;;  %v150_v10 = vcvt.s32.f32 %v141_v9  ;;  %s706_s5 = smov [#allocation5]  }
  0x3f   : > { %p630_p12 = pnand %p629_p6, %p938_p11  ;;  %s632_s11 = sshll.u32 %s706_s5, 4  ;;  %s633_s11 = int_to_ptr.vmem [resolvable:$false] %s632_s11 }
  0x40   : > { %v146_v4 = vcvt.s32.f32 %v145_v3  ;;  %s634_s13 = scalar_lea.vmem %s633_s11, 256  ;;  %p635_p8 = scmp.lt.s32.totalorder %s878_s27, %s633_s11 }
  0x41   : > { %p631_p13 = pneg %p630_p12  ;;  %p636_p10 = scmp.lt.s32.totalorder %s634_s13, %s628_s4 }
  0x42   : > { %v147_v5 = vmul.f32 -0.28782314, %v146_v4 }
  0x43   : > { %p637_p0 = por %p636_p10, %p635_p8 }
  0x44   : > { %v148_v6 = vmul.f32 1.442695, %v147_v5 }
  0x45   : > { %p638_p2 = pnand %p637_p0, %p631_p13 }
  0x46   : > { %592 = vpow2.f32 %v148_v6 }
  0x50   : > { %v593_v11 = vpop.eup %592 }
  0x51   : > { %v845_v12 = vmul.f32 %v593_v11, %v150_v10 }
  0x53   : > { %v156_v13 = vand.u32 2139095040, %v845_v12  ;;  %v153_v15 = vand.u32 2147483647, %v845_v12  ;;  %vm155_vm7 = vcmp.lt.s32.totalorder %v845_v12, 0  ;;  %vm245_vm15 = vweird.f32 %v845_v12 }
  0x55   : > { %v157_v14 = vshrl.u32 %v156_v13, 23  ;;  %v160_v18 = vand.u32 8388607, %v153_v15  ;;  %vm154_vm8 = vcmp.le.f32.partialorder %v153_v15, 0.7853982 }
  0x57   : > { %v516_v16 = vadd.s32 4294967169, %v157_v14  ;;  %v161_v21 = vor.u32 8388608, %v160_v18 }
  0x59   : > { %v163_v17 = vadd.s32 1, %v516_v16  ;;  %v201_v41 = vshll.u32 %v161_v21, 8 }
  0x5b   : > { %vm164_vm0 = vcmp.gt.s32.totalorder %v163_v17, 0 }
  0x5c   : > { %v165_v19 = vsel %vm164_vm0, %v163_v17, 0  ;;  %vm152_vm0 = vcmp.eq.s32.totalorder %v144_v2, 0  ;;  %v361_v2 = vld [vmem:[%s829_s30] sm:$0x3] }
  0x5d   : > { %v167_v20 = vand.u32 31, %v165_v19  ;;  %v166_v22 = vshrl.u32 %v165_v19, 5 }
  0x5f   : > { %v168_v23 = vsub.s32 32, %v167_v20  ;;  %v170_v25 = vshll.u32 %v699_v24, %v167_v20  ;;  %v173_v27 = vshll.u32 %v700_v26, %v167_v20  ;;  %v176_v29 = vshll.u32 %v701_v28, %v167_v20 }
  0x60   : > { %v179_v31 = vshll.u32 %v702_v30, %v167_v20  ;;  %v182_v33 = vshll.u32 %v703_v32, %v167_v20  ;;  %vm185_vm1 = vcmp.lt.s32.totalorder %v166_v22, 1  ;;  %vm188_vm2 = vcmp.lt.s32.totalorder %v166_v22, 4 }
  0x61   : > { %v169_v34 = vshrl.u32 %v699_v24, %v168_v23  ;;  %v171_v35 = vshrl.u32 %v700_v26, %v168_v23  ;;  %v174_v36 = vshrl.u32 %v701_v28, %v168_v23  ;;  %v177_v37 = vshrl.u32 %v702_v30, %v168_v23 }
  0x62   : > { %v180_v38 = vshrl.u32 %v703_v32, %v168_v23  ;;  %v183_v40 = vshrl.u32 %v704_v39, %v168_v23  ;;  %vm186_vm3 = vcmp.lt.s32.totalorder %v166_v22, 2  ;;  %vm187_vm4 = vcmp.lt.s32.totalorder %v166_v22, 3 }
  0x63   : > { %v172_v42 = vor.u32 %v171_v35, %v170_v25  ;;  %v175_v43 = vor.u32 %v174_v36, %v173_v27  ;;  %v178_v44 = vor.u32 %v177_v37, %v176_v29 }
  0x64   : > { %v181_v45 = vor.u32 %v180_v38, %v179_v31  ;;  %v184_v46 = vor.u32 %v183_v40, %v182_v33  ;;  %v705_v38 = vmov 1966171168  }
  0x65   : > { %v189_v47 = vsel %vm185_vm1, %v169_v34, %v172_v42  ;;  %v190_v48 = vsel %vm188_vm2, %v178_v44, 2102212464  ;;  %v193_v49 = vsel %vm185_vm1, %v172_v42, %v175_v43  ;;  %v197_v50 = vsel %vm185_vm1, %v175_v43, %v178_v44 }
  0x66   : > { %v191_v51 = vsel %vm187_vm4, %v175_v43, %v190_v48  ;;  %v194_v52 = vsel %vm188_vm2, %v181_v45, 920167782  ;;  %v198_v53 = vsel %vm188_vm2, %v184_v46, 1326507024  ;;  %v367_v39 = vunpack.c.l.s4 %v705_v38 }
  0x67   : > { %v195_v54 = vsel %vm187_vm4, %v178_v44, %v194_v52  ;;  %v199_v55 = vsel %vm187_vm4, %v181_v45, %v198_v53  ;;  %v192_v56 = vsel %vm186_vm3, %v189_v47, %v191_v51  ;;  %vm414_vm1 = vcmask 254976  }
  0x68   : > { %v196_v57 = vsel %vm186_vm3, %v193_v49, %v195_v54  ;;  %v200_v58 = vsel %vm186_vm3, %v197_v50, %v199_v55  ;;  %v208_v63 = vmul.u32 %v201_v41, %v192_v56 }
  0x69   : > { %v851_v59 = vmul.u32.u64.low %v201_v41, %v200_v58  ;;  %v852_v60 = vmul.u32.u64.high %v201_v41, %v200_v58, %v851_v59  ;;  %v854_v61 = vmul.u32.u64.low %v201_v41, %v196_v57  ;;  %v855_v62 = vmul.u32.u64.high %v201_v41, %v196_v57, %v854_v61 }
  0x6a   : > { %v368_v41 = vunpack.c.0.s8 %v367_v39  ;;  %v362_v59 = vld [vmem:[%s829_s30 + $0x2] sm:$0x3] }
  0x6b   : > { %vm210_vm5 = vc.u32 %v852_v60, %v854_v61  ;;  %v211_v0 = vadd.s32 1, %v855_v62  ;;  %v209_v16 = vadd.s32 %v854_v61, %v852_v60  ;;  %v363_v60 = vld [vmem:[%s829_s30 + $0x4] sm:$0x3] }
  0x6c   : > { %v371_v48 = vsub.s32 %v368_v41, %v842_v7 }
  0x6d   : > { %v212_v3 = vsel %vm210_vm5, %v211_v0, %v855_v62 }
  0x6e   : > { %v213_v4 = vadd.s32 %v212_v3, %v208_v63 }
  0x70   : > { %v214_v5 = vadd.s32 536870912, %v213_v4 }
  0x72   : > { %v215_v6 = vshrl.u32 %v214_v5, 30 }
  0x74   : > { %v216_v8 = vshll.u32 %v215_v6, 30  ;;  %v239_v28 = vsub.s32 4, %v215_v6 }
  0x76   : > { %v217_v9 = vsub.s32 %v213_v4, %v216_v8  ;;  %v240_v31 = vsel %vm155_vm7, %v239_v28, %v215_v6 }
  0x77   : > { %v242_v34 = vsel %vm154_vm8, 0, %v240_v31 }
  0x78   : > { %v219_v10 = vsub.s32 0, %v217_v9  ;;  %v246_v35 = vadd.s32 3, %v242_v34  ;;  %v350_v37 = vand.u32 3, %v242_v34 }
  0x7a   : > { %v517_v11 = vmin.u32 %v219_v10, %v217_v9  ;;  %v247_v36 = vand.u32 3, %v246_v35  ;;  %vm355_vm10 = vcmp.eq.s32.totalorder %v350_v37, 2  ;;  %vm352_vm12 = vcmp.eq.s32.totalorder %v350_v37, 0 }
  0x7b   : > { %vm351_vm14 = vcmp.lt.s32.totalorder %v350_v37, 2 }
  0x7c   : > { %v221_v13 = vclz %v517_v11  ;;  %vm252_vm9 = vcmp.eq.s32.totalorder %v247_v36, 2  ;;  %vm249_vm11 = vcmp.eq.s32.totalorder %v247_v36, 0  ;;  %vm248_vm13 = vcmp.lt.s32.totalorder %v247_v36, 2 }
  0x7e   : > { %v518_v14 = vadd.s32 4294967294, %v221_v13 }
  0x80   : > { %vm519_vm6 = vcmp.lt.s32.totalorder %v518_v14, 0 }
  0x81   : > { %v224_v17 = vsel %vm519_vm6, 0, %v518_v14 }
  0x82   : > { %v225_v18 = vsub.s32 32, %v224_v17  ;;  %v226_v19 = vshll.u32 %v217_v9, %v224_v17  ;;  %v229_v20 = vsub.s32 4294967266, %v224_v17 }
  0x84   : > { %v227_v21 = vshrl.u32 %v209_v16, %v225_v18  ;;  %v230_v22 = vadd.s32 127, %v229_v20 }
  0x86   : > { %v228_v23 = vor.u32 %v227_v21, %v226_v19  ;;  %v231_v24 = vshll.u32 %v230_v22, 23 }
  0x88   : > { %v232_v25 = vor.u32 4788187, %v231_v24  ;;  %v235_v26 = vcvt.s32.f32 %v228_v23 }
  0x8a   : > { %v233_v27 = vand.u32 2147483647, %v232_v25 }
  0x8c   : > { %v236_v29 = vmul.f32 %v235_v26, %v233_v27 }
  0x8e   : > { %v237_v30 = vxor.u32 2147483648, %v236_v29 }
  0x90   : > { %v238_v32 = vsel %vm155_vm7, %v237_v30, %v236_v29 }
  0x91   : > { %v241_v33 = vsel %vm154_vm8, %v845_v12, %v238_v32  ;;  %v392_v12 = vsub.s32 0, %v842_v7  ;;  %v364_v7 = vld [vmem:[%s829_s30 + $0x6] sm:$0x3] }
  0x92   : > { %594 = vcosq.f32 %v241_v33 }
  0x93   : > { %596 = vsinq.f32 %v241_v33 }
  0x9c   : > { %v595_v40 = vpop.eup %594 }
  0x9d   : > { %v597_v42 = vpop.eup %596  ;;  %v253_v15 = vxor.u32 2147483648, %v595_v40 }
  0x9e   : > { %v250_v43 = vxor.u32 2147483648, %v597_v42 }
  0x9f   : > { %v254_v44 = vsel %vm252_vm9, %v253_v15, %v597_v42  ;;  %v357_v45 = vsel %vm355_vm10, %v253_v15, %v597_v42 }
  0xa0   : > { %v251_v46 = vsel %vm249_vm11, %v595_v40, %v250_v43  ;;  %v354_v47 = vsel %vm352_vm12, %v595_v40, %v250_v43 }
  0xa1   : > { %v255_v49 = vsel %vm248_vm13, %v251_v46, %v254_v44  ;;  %v358_v50 = vsel %vm351_vm14, %v354_v47, %v357_v45 }
  0xa2   : > { %v256_v51 = vsel %vm245_vm15, nan, %v255_v49  ;;  %v359_v52 = vsel %vm245_vm15, nan, %v358_v50 }
  0xa3   : > { %v360_v53 = vsel %vm152_vm0, %v256_v51, %v359_v52 }
  0xa4   : > { %v372_v54 = vrot.slane %v360_v53, %v371_v48 }
  0xa6   : > { %v380_v55 = vrot.slane %v372_v54, %v371_v48  ;;  %v373_v1 = vcombine.high %v372_v54, %v372_v54 }
  0xa8   : > { %v393_v56 = vrot.slane %v380_v55, %v392_v12  ;;  %v387_v57 = vrot.slane %v373_v1, %v371_v48  ;;  %v388_v58 = vcombine.high %v380_v55, %v380_v55 }
  0xaa   : > { %v410_v61 = vadd.f32 %v393_v56, %v361_v2  ;;  %v397_v62 = vrot.slane %v387_v57, %v392_v12  ;;  %v401_v63 = vrot.slane %v388_v58, %v392_v12  ;;  %v389_v0 = vcombine.high %v387_v57, %v387_v57 }
  0xac   : > { %415 = vst.msk [vmem:[%s134_s17] sm:$0x3] %vm414_vm1, %v410_v61  ;;  %v411_v3 = vadd.f32 %v397_v62, %v362_v59  ;;  %v412_v4 = vadd.f32 %v401_v63, %v363_v60  ;;  %v405_v5 = vrot.slane %v389_v0, %v392_v12 }
  0xae   : > { %416 = vst.msk [vmem:[%s134_s17 + $0x2] sm:$0x3] %vm414_vm1, %v411_v3  ;;  %417 = vst.msk [vmem:[%s134_s17 + $0x4] sm:$0x3] %vm414_vm1, %v412_v4  ;;  %v413_v6 = vadd.f32 %v405_v5, %v364_v7 }
  0xb0   : > { %418 = vst.msk [vmem:[%s134_s17 + $0x6] sm:$0x3] %vm414_vm1, %v413_v6 }
  0xb1   : > { %641 = shalt.err (!%p638_p2)
}
  0xb2   : > { %s642_s14 = scalar_lea.hbm %s883_s3, 128  ;;  %s646_s21 = scalar_lea.hbm %s931_s1, 256 }
  0xb3   : > { %p643_p4 = scmp.ne.s32.totalorder %s883_s3, %s642_s14  ;;  %p647_p9 = scmp.lt.u32.totalorder %s883_s3, %s931_s1 }
  0xb4   : > { %p648_p1 = scmp.lt.u32.totalorder %s646_s21, %s642_s14  ;;  %p650_p6 = scmp.lt.u32.totalorder %s642_s14, %s883_s3 }
  0xb5   : > { %p644_p5 = pnand %p643_p4, %p938_p11 }
  0xb6   : > { %p649_p3 = por %p648_p1, %p647_p9 }
  0xb7   : > { %p645_p7 = pneg %p644_p5 }
  0xb8   : > { %p651_p12 = por %p650_p6, %p649_p3 }
  0xba   : > { %p652_p13 = pnand %p651_p12, %p645_p7 }
  0xbc   : > { %655 = shalt.err (!%p652_p13)
}
  0xbd   : > { %s707_s26 = smov 32   ;;  %s708_s30 = smov 2  }
  0xbe   : > { %537 = dma.vmem_to_hbm [thread:$0]  (%p938_p11), %s878_s27, 128, %s883_s3, %s420_s10, %s707_s26, %s707_s26, %s708_s30  }
  0xbf PF: > { %s448_s25 = sand.u32 1, %s682_s6   ;;  %p939_p8 = scmp.ne.s32.totalorder %s936_s19, 0 }
  0xc0   : > { %p940_p10 = scmp.ge.s32.totalorder %s694_s9, 2  ;;  %s449_s17 = scalar_lea.sflag [#allocation4], %s448_s25 }
  0xc2   : > { %p544_p0 = pnand %p940_p10, %p939_p8 }
  0xc4   : > { %677 = dma.done.wait (!%p544_p0), %s449_s17, 128  }
  0xc5   : > { %679 = vsyncadd (!%p544_p0), %s449_s17, 4294967168  ;;  %p14_p2 = scmp.ge.s32.totalorder %s744_s12, 4   ;;  %s941_s6 = smov %s686_s7 }
  0xc6   : > { %s942_s7 = smov %s690_s8  ;;  %s943_s8 = smov %s756_s15 }
  0xc7   : > { %s944_s9 = smov %s744_s12  ;;  %16 = sbr.rel (!%p14_p2) target bundleno = 5 (0x5), region = 69 }
  0xce   :  { %454 = vsyncpa [#allocation3], 1 }
  0xcf   :  { %456 = vsyncpa [#allocation3 + $0x1], 1 }
  0xd0   :  { %457 = vsyncpa [#allocation4], 1 }
  0xd1   :  { %459 = vsyncpa [#allocation4 + $0x1], 1 }

</bundles_post_ra>
